<compile_context>
chip_gen: v7x
topology: tpu7x:2x2x1
jax: 0.10.0
libtpu: 0.0.40
codegen_flags: <defaults>
</compile_context>

<pallas_src>
import numpy as np
import jax
import jax.numpy as jnp
from jax import lax
from jax.experimental import pallas as pl
from jax.experimental.pallas import tpu as pltpu

TM_MLP = 8192           # M-tile for the point MLP (mem-bound, big tiles win)
TH_CLS = 8              # H-rows per classifier/TTA block (multiple of 8)
_VMEM_LIMIT = 48 * 1024 * 1024   # v7x-safe cap (<= ~48 MiB of 64 MiB VMEM)


# ----------------------------------------------------------------------------
# Pallas kernels
# ----------------------------------------------------------------------------
def _pt_mlp_kernel(x_ref, w1_ref, b1_ref, w2_ref, b2_ref, o_ref):
    """Fused point-wise MLP: relu(x@w1+b1)@w2+b2.  bf16 in, f32 accumulation.

    Ragged tail blocks contain garbage rows; safe because rows are independent
    and partial output writes are masked by Pallas.
    """
    h = jnp.dot(x_ref[...], w1_ref[...], preferred_element_type=jnp.float32)
    h = jnp.maximum(h + b1_ref[...], 0.0).astype(jnp.bfloat16)
    y = jnp.dot(h, w2_ref[...], preferred_element_type=jnp.float32)
    o_ref[...] = (y + b2_ref[...]).astype(o_ref.dtype)


def pallas_point_mlp(x, w1, b1, w2, b2, out_dtype=jnp.bfloat16, tm=TM_MLP):
    """y = relu(x@w1+b1)@w2+b2 in one pallas_call. x: [M, K] (bf16)."""
    M, K = x.shape
    Hd = w1.shape[1]
    N = w2.shape[1]
    tm_eff = min(tm, M)
    return pl.pallas_call(
        _pt_mlp_kernel,
        out_shape=jax.ShapeDtypeStruct((M, N), out_dtype),
        grid=(pl.cdiv(M, tm_eff),),
        in_specs=[
            pl.BlockSpec((tm_eff, K), lambda i: (i, 0)),
            pl.BlockSpec((K, Hd), lambda i: (0, 0)),
            pl.BlockSpec((1, Hd), lambda i: (0, 0)),
            pl.BlockSpec((Hd, N), lambda i: (0, 0)),
            pl.BlockSpec((1, N), lambda i: (0, 0)),
        ],
        out_specs=pl.BlockSpec((tm_eff, N), lambda i: (i, 0)),
        compiler_params=pltpu.CompilerParams(
            dimension_semantics=("parallel",),
            vmem_limit_bytes=_VMEM_LIMIT),
    )(x, w1, b1.reshape(1, Hd).astype(jnp.float32),
      w2, b2.reshape(1, N).astype(jnp.float32))


def _dense_cls_kernel(x_ref, wt_ref, b_ref, o_ref):
    """Per-voxel classifier over one (th, W, Z, C) feature slab.

    Writes (nclass, th, W*Z) logits (NCDHW-compatible, lane-dense W*Z minor).
    """
    th, W, Z, C = x_ref.shape
    for i in range(th):                                   # th small (<= 8)
        rows = x_ref[i].reshape(W * Z, C)                 # safe reshape
        yt = lax.dot_general(wt_ref[...], rows, (((1,), (1,)), ((), ())),
                             preferred_element_type=jnp.float32)
        o_ref[:, i, :] = (yt + b_ref[...]).astype(o_ref.dtype)


def pallas_dense_classifier(dense, wc, bc, *, th=TH_CLS):
    """Per-voxel (1x1x1) classifier over a dense voxel grid.

    dense: [B, H, W, Z, C] (bf16).  Returns [B, nclass, H, W, Z] f32 with no
    XLA transpose: the kernel writes directly in channel-major order and the
    trailing reshape is contiguous (free).
    """
    B, H, W, Z, C = dense.shape
    nclass = wc.shape[1]
    th = min(th, H)
    wt = wc.T.astype(jnp.bfloat16)                       # (nclass, C)
    b = bc.reshape(nclass, 1).astype(jnp.float32)
    out = pl.pallas_call(
        _dense_cls_kernel,
        out_shape=jax.ShapeDtypeStruct((B, nclass, H, W * Z), jnp.float32),
        grid=(B, pl.cdiv(H, th)),
        in_specs=[
            pl.BlockSpec((None, th, W, Z, C), lambda bb, hh: (bb, hh, 0, 0, 0)),
            pl.BlockSpec((nclass, C), lambda bb, hh: (0, 0)),
            pl.BlockSpec((nclass, 1), lambda bb, hh: (0, 0)),
        ],
        out_specs=pl.BlockSpec((None, nclass, th, W * Z),
                               lambda bb, hh: (bb, 0, hh, 0)),
        compiler_params=pltpu.CompilerParams(
            dimension_semantics=("parallel", "parallel"),
            vmem_limit_bytes=_VMEM_LIMIT),
    )(dense.astype(jnp.bfloat16), wt, b)
    return out.reshape(B, nclass, H, W, Z)


def _tta_fuse_cls_kernel(x_ref, wt_ref, b_ref, o_ref):
    """Fused TTA voting + per-voxel classifier.

    x_ref:  (th, W, Z, C) bf16 feature slab of voting member v (members v>0
            were already W-flipped at scatter time, so no flip is needed).
    o_ref:  (nclass, th, W*Z) f32 logits, resident across the voting axis.
    Each member contributes its own bias, matching sum_v (x_v @ wc + bc).
    """
    v = pl.program_id(1)
    th, W, Z, C = x_ref.shape

    @pl.when(v == 0)
    def _():
        o_ref[...] = jnp.zeros_like(o_ref)

    for i in range(th):
        rows = x_ref[i].reshape(W * Z, C)
        yt = lax.dot_general(wt_ref[...], rows, (((1,), (1,)), ((), ())),
                             preferred_element_type=jnp.float32)
        o_ref[:, i, :] += yt + b_ref[...]


def pallas_tta_fused_classifier(dense_v, wc, bc, *, th=TH_CLS):
    """fused logits = sum_v classifier(dense_v[v]).

    dense_v: [V, H, W, Z, C] bf16 (members 1..V-1 pre-W-flipped).
    Returns [nclass, H, W, Z] f32.  The V-member logits volume never hits HBM.
    """
    V, H, W, Z, C = dense_v.shape
    nclass = wc.shape[1]
    th = min(th, H)
    wt = wc.T.astype(jnp.bfloat16)
    b = bc.reshape(nclass, 1).astype(jnp.float32)
    out = pl.pallas_call(
        _tta_fuse_cls_kernel,
        out_shape=jax.ShapeDtypeStruct((nclass, H, W * Z), jnp.float32),
        grid=(pl.cdiv(H, th), V),
        in_specs=[
            pl.BlockSpec((None, th, W, Z, C), lambda hh, vv: (vv, hh, 0, 0, 0)),
            pl.BlockSpec((nclass, C), lambda hh, vv: (0, 0)),
            pl.BlockSpec((nclass, 1), lambda hh, vv: (0, 0)),
        ],
        out_specs=pl.BlockSpec((nclass, th, W * Z), lambda hh, vv: (0, hh, 0)),
        compiler_params=pltpu.CompilerParams(
            dimension_semantics=("parallel", "arbitrary"),
            vmem_limit_bytes=_VMEM_LIMIT),
    )(dense_v.astype(jnp.bfloat16), wt, b)
    return out.reshape(nclass, H, W, Z)


# ----------------------------------------------------------------------------
# Glue / sub-modules
# ----------------------------------------------------------------------------
def _init_linear(key, fan_in, fan_out):
    k1, k2 = jax.random.split(key)
    w = jax.random.normal(k1, (fan_in, fan_out), jnp.float32) / np.sqrt(fan_in)
    b = 0.01 * jax.random.normal(k2, (fan_out,), jnp.float32)
    return w, b


def scatter_max_to_dense(features, coords, batch_size, sparse_shape):
    """Scatter-max point features into a dense voxel grid [B, H, W, Z, C].
    TODO(synk): replace the XLA .at[].max scatter with sort+segment-max or a
    Pallas scalar-prefetch scatter kernel (biggest remaining end-to-end cost).
    """
    H, W, Z = sparse_shape
    C = features.shape[1]
    flat_ids = ((coords[:, 0] * H + coords[:, 1]) * W + coords[:, 2]) * Z \
               + coords[:, 3]
    dense = jnp.full((batch_size * H * W * Z, C), -jnp.inf, features.dtype)
    dense = dense.at[flat_ids].max(features)
    dense = jnp.where(jnp.isfinite(dense), dense,
                      jnp.zeros((), features.dtype))
    return dense.reshape(batch_size, H, W, Z, C)


class CylinderFea:
    """Point-wise MLP (single fused Pallas kernel) + coord concat.
    Stand-in for `cylin_model` (cylinder_fea)."""

    def __init__(self, fea_dim, hidden_dim, out_dim, key):
        k1, k2 = jax.random.split(key)
        self.w1, self.b1 = _init_linear(k1, fea_dim, hidden_dim)
        self.w2, self.b2 = _init_linear(k2, hidden_dim, out_dim)

    def __call__(self, pt_fea_list, vox_list):
        pt_fea = jnp.concatenate(pt_fea_list, axis=0)
        coords = jnp.concatenate(
            [jnp.pad(v, ((0, 0), (1, 0)), constant_values=i)
             for i, v in enumerate(vox_list)], axis=0).astype(jnp.int32)
        feats = pallas_point_mlp(pt_fea.astype(jnp.bfloat16),
                                 self.w1.astype(jnp.bfloat16), self.b1,
                                 self.w2.astype(jnp.bfloat16), self.b2,
                                 out_dtype=jnp.bfloat16)
        return coords, feats


class SpconvSegStandin:
    """Per-voxel linear classifier over the densified grid (Pallas kernels).
    TODO(synk): real cylinder_3d_spconv_seg = submanifold sparse 3D convs."""

    def __init__(self, in_dim, nclass, sparse_shape, key):
        self.wc, self.bc = _init_linear(key, in_dim, nclass)
        self.sparse_shape = tuple(sparse_shape)
        self.nclass = nclass

    def __call__(self, features, coords, batch_size, extraction='all'):
        dense = scatter_max_to_dense(features, coords, batch_size,
                                     self.sparse_shape)      # [B,H,W,Z,C] bf16
        return pallas_dense_classifier(dense, self.wc, self.bc)

    def forward_tta_fused(self, features, coords, batch_size, voting_num,
                          extraction='all'):
        # Fold the W-flip of voting members 1..V-1 into the scatter coords:
        # a voxel permutation commutes with per-voxel scatter-max and with the
        # per-voxel affine classifier, so the fuse kernel needs no flip.
        H, W, Z = self.sparse_shape
        bidx = coords[:, 0]
        mirror = (bidx > 0) & (bidx < voting_num)
        coords = coords.at[:, 2].set(
            jnp.where(mirror, W - 1 - coords[:, 2], coords[:, 2]))
        dense = scatter_max_to_dense(features, coords, batch_size,
                                     self.sparse_shape)
        return pallas_tta_fused_classifier(dense[:voting_num],
                                           self.wc, self.bc)


class CylinderAsym:
    """JAX/Pallas port of network/cylinder_spconv_3d_unlock.py::cylinder_asym."""

    def __init__(self, cylin_model, segmentator_spconv, sparse_shape):
        self.name = 'cylinder_asym'
        self.cylinder_3d_generator = cylin_model
        self.cylinder_3d_spconv_seg = segmentator_spconv
        self.sparse_shape = sparse_shape

    def forward(self, train_pt_fea_ten, train_vox_ten, batch_size,
                val_grid=None, voting_num=4, use_tta=False, extraction='all'):
        coords, features_3d = self.cylinder_3d_generator(
            train_pt_fea_ten, train_vox_ten)
        if use_tta:
            batch_size *= voting_num
            fused_predict = self.cylinder_3d_spconv_seg.forward_tta_fused(
                features_3d, coords, batch_size, voting_num, extraction)
            return fused_predict[None]          # torch.unsqueeze(fused, 0)
        spatial_features = self.cylinder_3d_spconv_seg(
            features_3d, coords, batch_size, extraction)
        return spatial_features


# ----------------------------------------------------------------------------
# Reference (numpy scatter-max so the densify step is validated independently;
# it mirrors the bf16 quantization points of the Pallas path so the check
# isolates kernel correctness rather than dtype-storage policy).
# ----------------------------------------------------------------------------
def _numpy_scatter_max(features_f32, coords_np, batch_size, sparse_shape):
    H, W, Z = sparse_shape
    C = features_f32.shape[1]
    dense = np.full((batch_size, H, W, Z, C), -np.inf, np.float32)
    for p in range(coords_np.shape[0]):
        b, h, w, z = (int(coords_np[p, 0]), int(coords_np[p, 1]),
                      int(coords_np[p, 2]), int(coords_np[p, 3]))
        dense[b, h, w, z] = np.maximum(dense[b, h, w, z], features_f32[p])
    dense[~np.isfinite(dense)] = 0.0
    return dense


def reference_forward(model, pt_fea_list, vox_list, batch_size,
                      voting_num=4, use_tta=False):
    gen = model.cylinder_3d_generator
    seg = model.cylinder_3d_spconv_seg
    hi = lax.Precision.HIGHEST
    pt_fea = jnp.concatenate(pt_fea_list, axis=0)
    coords = jnp.concatenate(
        [jnp.pad(v, ((0, 0), (1, 0)), constant_values=i)
         for i, v in enumerate(vox_list)], axis=0).astype(jnp.int32)

    x = pt_fea.astype(jnp.bfloat16).astype(jnp.float32)
    w1 = gen.w1.astype(jnp.bfloat16).astype(jnp.float32)
    w2 = gen.w2.astype(jnp.bfloat16).astype(jnp.float32)
    h = jnp.maximum(jnp.dot(x, w1, precision=hi) + gen.b1, 0.0)
    h = h.astype(jnp.bfloat16).astype(jnp.float32)
    feats = (jnp.dot(h, w2, precision=hi) + gen.b2).astype(jnp.bfloat16)

    bs = batch_size * voting_num if use_tta else batch_size
    H, W, Z = seg.sparse_shape
    feats_np = np.asarray(jnp.asarray(feats, jnp.float32))
    coords_np = np.asarray(coords)
    dense = _numpy_scatter_max(feats_np, coords_np, bs, seg.sparse_shape)

    wc = np.asarray(jnp.asarray(seg.wc.astype(jnp.bfloat16), jnp.float32))
    bc = np.asarray(seg.bc)
    logits = dense.reshape(bs * H * W * Z, -1) @ wc + bc
    spatial = logits.reshape(bs, H, W, Z, seg.nclass).transpose(0, 4, 1, 2, 3)
    if not use_tta:
        return spatial
    fused = spatial[0].copy()
    for idx in range(1, voting_num):
        fused = fused + np.flip(spatial[idx], axis=2)
    return fused[None]


# ----------------------------------------------------------------------------
if __name__ == "__main__":
    key = jax.random.PRNGKey(0)
    fea_dim, hidden, out_dim, nclass = 16, 64, 32, 16
    sparse_shape = (16, 16, 8)          # (H, W, Z); W*Z = 128 (lane-dense)
    n_pts, batch = 256, 2
    voting_num = 4

    k_gen, k_seg, k_data = jax.random.split(key, 3)
    cylin = CylinderFea(fea_dim, hidden, out_dim, k_gen)
    seg = SpconvSegStandin(out_dim, nclass, sparse_shape, k_seg)
    model = CylinderAsym(cylin, seg, sparse_shape)

    def make_batch(k, n_entries):
        feas, voxs = [], []
        for i in range(n_entries):
            kk = jax.random.fold_in(k, i)
            kf, kv = jax.random.split(kk)
            feas.append(jax.random.normal(kf, (n_pts, fea_dim), jnp.float32))
            voxs.append(jnp.stack(
                [jax.random.randint(jax.random.fold_in(kv, d), (n_pts,), 0, s)
                 for d, s in enumerate(sparse_shape)], axis=1).astype(jnp.int32))
        return feas, voxs

    # --- standard (non-TTA) forward ---
    pt_fea, vox = make_batch(k_data, batch)
    out = model.forward(pt_fea, vox, batch_size=batch)
    out = jax.block_until_ready(out)
    assert out.shape == (batch, nclass) + sparse_shape
    ref = reference_forward(model, pt_fea, vox, batch)
    np.testing.assert_allclose(np.asarray(out), np.asarray(ref),
                               rtol=2e-2, atol=2e-2)

    # --- TTA forward (voting_num augmented copies, fused with W-flip) ---
    pt_fea_t, vox_t = make_batch(jax.random.fold_in(k_data, 99), 1 * voting_num)
    out_t = model.forward(pt_fea_t, vox_t, batch_size=1,
                          voting_num=voting_num, use_tta=True)
    out_t = jax.block_until_ready(out_t)
    assert out_t.shape == (1, nclass) + sparse_shape
    ref_t = reference_forward(model, pt_fea_t, vox_t, 1,
                              voting_num=voting_num, use_tta=True)
    np.testing.assert_allclose(np.asarray(out_t), np.asarray(ref_t),
                               rtol=2e-2, atol=2e-2)

    print("KERNEL_OK")
</pallas_src>

<mosaic_0001>
module attributes {stable_mosaic.version = 11 : i64} {
  func.func @_pt_mlp_kernel(%arg0: i32, %arg1: memref<512x16xbf16, #tpu.memory_space<vmem>>, %arg2: memref<16x64xbf16, #tpu.memory_space<vmem>>, %arg3: memref<1x64xf32, #tpu.memory_space<vmem>>, %arg4: memref<64x32xbf16, #tpu.memory_space<vmem>>, %arg5: memref<1x32xf32, #tpu.memory_space<vmem>>, %arg6: memref<512x32xbf16, #tpu.memory_space<vmem>>) attributes {dimension_semantics = [#tpu.dimension_semantics<parallel>], iteration_bounds = array<i64: 1>, scalar_prefetch = 0 : i64, scratch_operands = 0 : i64, tpu.core_type = #tpu.core_type<tc>, window_params = [{transform_indices = @transform_0, window_bounds = array<i64: 512, 16>}, {pipeline_mode = #tpu.pipeline_mode<synchronous>, transform_indices = @transform_1, window_bounds = array<i64: 16, 64>}, {pipeline_mode = #tpu.pipeline_mode<synchronous>, transform_indices = @transform_2, window_bounds = array<i64: 1, 64>}, {pipeline_mode = #tpu.pipeline_mode<synchronous>, transform_indices = @transform_3, window_bounds = array<i64: 64, 32>}, {pipeline_mode = #tpu.pipeline_mode<synchronous>, transform_indices = @transform_4, window_bounds = array<i64: 1, 32>}, {transform_indices = @transform_5, window_bounds = array<i64: 512, 32>}]} {
    %c0 = arith.constant 0 : index
    %c0_0 = arith.constant 0 : index
    %0 = vector.load %arg1[%c0, %c0_0] : memref<512x16xbf16, #tpu.memory_space<vmem>>, vector<512x16xbf16>
    %c0_1 = arith.constant 0 : index
    %c0_2 = arith.constant 0 : index
    %1 = vector.load %arg2[%c0_1, %c0_2] : memref<16x64xbf16, #tpu.memory_space<vmem>>, vector<16x64xbf16>
    %cst = arith.constant dense<0.000000e+00> : vector<512x64xf32>
    %2 = tpu.matmul %0, %1, %cst {dimension_numbers = #tpu.dot_dimension_numbers<[1], [0], [0], [1], [0, 0, 1, 1], [], []>} : vector<512x16xbf16>, vector<16x64xbf16>, vector<512x64xf32> -> vector<512x64xf32>
    %c0_3 = arith.constant 0 : index
    %c0_4 = arith.constant 0 : index
    %3 = vector.load %arg3[%c0_3, %c0_4] : memref<1x64xf32, #tpu.memory_space<vmem>>, vector<1x64xf32>
    %4 = vector.broadcast %3 : vector<1x64xf32> to vector<512x64xf32>
    %5 = arith.addf %2, %4 : vector<512x64xf32>
    %cst_5 = arith.constant 0.000000e+00 : f32
    %6 = vector.broadcast %cst_5 : f32 to vector<512x64xf32>
    %7 = arith.maximumf %5, %6 : vector<512x64xf32>
    %8 = arith.truncf %7 : vector<512x64xf32> to vector<512x64xbf16>
    %c0_6 = arith.constant 0 : index
    %c0_7 = arith.constant 0 : index
    %9 = vector.load %arg4[%c0_6, %c0_7] : memref<64x32xbf16, #tpu.memory_space<vmem>>, vector<64x32xbf16>
    %cst_8 = arith.constant dense<0.000000e+00> : vector<512x32xf32>
    %10 = tpu.matmul %8, %9, %cst_8 {dimension_numbers = #tpu.dot_dimension_numbers<[1], [0], [0], [1], [0, 0, 1, 1], [], []>} : vector<512x64xbf16>, vector<64x32xbf16>, vector<512x32xf32> -> vector<512x32xf32>
    %c0_9 = arith.constant 0 : index
    %c0_10 = arith.constant 0 : index
    %11 = vector.load %arg5[%c0_9, %c0_10] : memref<1x32xf32, #tpu.memory_space<vmem>>, vector<1x32xf32>
    %12 = vector.broadcast %11 : vector<1x32xf32> to vector<512x32xf32>
    %13 = arith.addf %10, %12 : vector<512x32xf32>
    %14 = arith.truncf %13 : vector<512x32xf32> to vector<512x32xbf16>
    %c0_11 = arith.constant 0 : index
    %c0_12 = arith.constant 0 : index
    %15 = vector.load %arg6[%c0_11, %c0_12] : memref<512x32xbf16, #tpu.memory_space<vmem>>, vector<512x32xbf16>
    tpu.vector_store %arg6[%c0_11, %c0_12], %14 {strides = array<i32>} : memref<512x32xbf16, #tpu.memory_space<vmem>>, vector<512x32xbf16>,
    return
  }
  func.func @transform_0(%arg0: i32) -> (i32, i32) {
    %c0_i32 = arith.constant 0 : i32
    %c0_i32_0 = arith.constant 0 : i32
    return %arg0, %c0_i32 : i32, i32
  }
  func.func @transform_1(%arg0: i32) -> (i32, i32) {
    %c0_i32 = arith.constant 0 : i32
    %c0_i32_0 = arith.constant 0 : i32
    %c0_i32_1 = arith.constant 0 : i32
    return %c0_i32, %c0_i32_0 : i32, i32
  }
  func.func @transform_2(%arg0: i32) -> (i32, i32) {
    %c0_i32 = arith.constant 0 : i32
    %c0_i32_0 = arith.constant 0 : i32
    %c0_i32_1 = arith.constant 0 : i32
    return %c0_i32, %c0_i32_0 : i32, i32
  }
  func.func @transform_3(%arg0: i32) -> (i32, i32) {
    %c0_i32 = arith.constant 0 : i32
    %c0_i32_0 = arith.constant 0 : i32
    %c0_i32_1 = arith.constant 0 : i32
    return %c0_i32, %c0_i32_0 : i32, i32
  }
  func.func @transform_4(%arg0: i32) -> (i32, i32) {
    %c0_i32 = arith.constant 0 : i32
    %c0_i32_0 = arith.constant 0 : i32
    %c0_i32_1 = arith.constant 0 : i32
    return %c0_i32, %c0_i32_0 : i32, i32
  }
  func.func @transform_5(%arg0: i32) -> (i32, i32) {
    %c0_i32 = arith.constant 0 : i32
    %c0_i32_0 = arith.constant 0 : i32
    return %arg0, %c0_i32 : i32, i32
  }
}

</mosaic_0001>

<bundles_post_ra>
// kernel: tpu_custom_call.1
= control target key start
LH: loop header
LB: loop body
LE: loop exit
PB: predicated region body
PF: predicated region fallthrough
CT: control target
= control target key end

     0   :  { %vm260_vm0 = vcmask 130048   ;;  %vm781_vm1 = vcmask 523264   ;;  %vm1423_vm2 = vcmask 257024   ;;  %s2566_s1 = inlined_call_operand.vmem [shape: bf16[16,64], index: 1, kind: input, shape index: {}]   ;;  %s2567_s0 = inlined_call_operand.vmem [shape: bf16[512,16], index: 0, kind: input, shape index: {}]   ;;  %s2568_s3 = inlined_call_operand.vmem [shape: bf16[64,32], index: 3, kind: input, shape index: {}]   ;;  %s2569_s2 = inlined_call_operand.vmem [shape: f32[1,64], index: 2, kind: input, shape index: {}]   ;;  %s2570_s4 = inlined_call_operand.vmem [shape: f32[1,32], index: 4, kind: input, shape index: {}]   ;;  %s2571_s5 = inlined_call_operand.vmem [shape: bf16[512,32], index: 5, kind: output, shape index: {}]  }
   0x1   :  { %v1930_v0 = vld [vmem:[%s2566_s1] sm:$0xff]   ;;  %v1932_v2 = vld [vmem:[%s2567_s0 + $0x8] sm:$0xff]   ;;  %v1933_v3 = vld [vmem:[%s2567_s0 + $0x10] sm:$0xff]  }
   0x2   :  { %v1931_v1 = vld [vmem:[%s2567_s0] sm:$0xff]   ;;  %1792 = vmatprep.subr.bf16.mxu0 %v1930_v0  ;;  %v1934_v4 = vld [vmem:[%s2567_s0 + $0x18] sm:$0xff]   ;;  %v1936_v6 = vld [vmem:[%s2567_s0 + $0x28] sm:$0xff]  }
   0x3   :  { %1793 = vmatpush3.bf16.msra.mxu0 %v1930_v0  ;;  %1794 = vmatprep.mubr.msk.bf16.mxu0 %vm260_vm0, %v1931_v1  ;;  %v1935_v5 = vld [vmem:[%s2567_s0 + $0x20] sm:$0xff]   ;;  %v1937_v7 = vld [vmem:[%s2567_s0 + $0x30] sm:$0xff]   ;;  %v1938_v8 = vld [vmem:[%s2567_s0 + $0x38] sm:$0xff]  }
   0x4   :  { %v1939_v9 = vld [vmem:[%s2567_s0 + $0x40] sm:$0xff]   ;;  %v1940_v10 = vld [vmem:[%s2567_s0 + $0x48] sm:$0xff]   ;;  %v1941_v11 = vld [vmem:[%s2567_s0 + $0x50] sm:$0xff]  }
   0x5   :  { %v1963_v12 = vld [vmem:[%s2568_s3] sm:$0xff]   ;;  %v1964_v13 = vld [vmem:[%s2568_s3 + $0x8] sm:$0xff]   ;;  %v1942_v14 = vld [vmem:[%s2567_s0 + $0x58] sm:$0xff]  }
   0x6   :  { %1795 = vmatmul.mubr.msk.bf16.vlgmr.msra.gmra.mrb[0].mxu0 %vm260_vm0, %v1932_v2  ;;  %1858 = vmatprep.subr.bf16.mxu1 %v1963_v12  ;;  %v1943_v15 = vld [vmem:[%s2567_s0 + $0x60] sm:$0xff]   ;;  %v1944_v16 = vld [vmem:[%s2567_s0 + $0x68] sm:$0xff]   ;;  %v1945_v17 = vld [vmem:[%s2567_s0 + $0x70] sm:$0xff]  }
   0x7   :  { %1798 = vmatprep.mubr.msk.bf16.mxu0 %vm260_vm0, %v1933_v3  ;;  %1859 = vmatpush3.bf16.msra.mxu1 %v1963_v12  ;;  %v1946_v18 = vld [vmem:[%s2567_s0 + $0x78] sm:$0xff]   ;;  %v1947_v19 = vld [vmem:[%s2567_s0 + $0x80] sm:$0xff]   ;;  %v1948_v20 = vld [vmem:[%s2567_s0 + $0x88] sm:$0xff]  }
   0x8   :  { %1860 = vmatprep.subr.bf16.mxu1 %v1964_v13  ;;  %v1949_v21 = vld [vmem:[%s2567_s0 + $0x90] sm:$0xff]   ;;  %v1950_v22 = vld [vmem:[%s2567_s0 + $0x98] sm:$0xff]   ;;  %v1951_v23 = vld [vmem:[%s2567_s0 + $0xa0] sm:$0xff]  }
   0x9   :  { %v1952_v24 = vld [vmem:[%s2567_s0 + $0xa8] sm:$0xff]   ;;  %v1953_v25 = vld [vmem:[%s2567_s0 + $0xb0] sm:$0xff]   ;;  %v1954_v26 = vld [vmem:[%s2567_s0 + $0xb8] sm:$0xff]  }
   0xa   :  { %v1965_v27 = vld [vmem:[%s2568_s3 + $0x10] sm:$0xff]   ;;  %v1955_v28 = vld [vmem:[%s2567_s0 + $0xc0] sm:$0xff]   ;;  %v1966_v29 = vld [vmem:[%s2568_s3 + $0x18] sm:$0xff]  }
   0xb   :  { %1861 = vmatpush3.bf16.msra.mxu1 %v1964_v13  ;;  %v1956_v30 = vld [vmem:[%s2567_s0 + $0xc8] sm:$0xff]   ;;  %v1957_v31 = vld [vmem:[%s2567_s0 + $0xd0] sm:$0xff]   ;;  %v1958_v32 = vld [vmem:[%s2567_s0 + $0xd8] sm:$0xff]  }
   0xc   :  { %1862 = vmatprep.subr.bf16.mxu1 %v1965_v27  ;;  %v1959_v33 = vld [vmem:[%s2567_s0 + $0xe0] sm:$0xff]   ;;  %v1960_v34 = vld [vmem:[%s2567_s0 + $0xe8] sm:$0xff]   ;;  %v1961_v35 = vld [vmem:[%s2567_s0 + $0xf0] sm:$0xff]  }
   0xd   :  { %v1962_v36 = vld [vmem:[%s2567_s0 + $0xf8] sm:$0xff]   ;;  %v2143_v37 = vld [vmem:[%s2569_s2] ss:$0 sm:$0xff] }
   0xe   :  { %1799 = vmatmul.mubr.msk.bf16.gmra.mrb[4].mxu0 %vm260_vm0, %v1934_v4 }
   0xf   :  { %1802 = vmatprep.mubr.msk.bf16.mxu0 %vm260_vm0, %v1935_v5  ;;  %1863 = vmatpush3.bf16.msra.mxu1 %v1965_v27 }
  0x10   :  { %1864 = vmatprep.subr.bf16.mxu1 %v1966_v29 }
  0x13   :  { %1865 = vmatpush3.bf16.msra.mxu1 %v1966_v29 }
  0x16   :  { %1803 = vmatmul.mubr.msk.bf16.gmra.mrb[8].mxu0 %vm260_vm0, %v1936_v6 }
  0x17   :  { %1806 = vmatprep.mubr.msk.bf16.mxu0 %vm260_vm0, %v1937_v7 }
  0x1e   :  { %1807 = vmatmul.mubr.msk.bf16.gmra.mrb[12].mxu0 %vm260_vm0, %v1938_v8 }
  0x1f   :  { %1810 = vmatprep.mubr.msk.bf16.mxu0 %vm260_vm0, %v1939_v9 }
  0x26   :  { %1811 = vmatmul.mubr.msk.bf16.gmra.mrb[16].mxu0 %vm260_vm0, %v1940_v10 }
  0x27   :  { %1814 = vmatprep.mubr.msk.bf16.mxu0 %vm260_vm0, %v1941_v11 }
  0x2e   :  { %1815 = vmatmul.mubr.msk.bf16.gmra.mrb[20].mxu0 %vm260_vm0, %v1942_v14 }
  0x2f   :  { %1818 = vmatprep.mubr.msk.bf16.mxu0 %vm260_vm0, %v1943_v15 }
  0x36   :  { %1819 = vmatmul.mubr.msk.bf16.gmra.mrb[24].mxu0 %vm260_vm0, %v1944_v16 }
  0x37   :  { %1822 = vmatprep.mubr.msk.bf16.mxu0 %vm260_vm0, %v1945_v17 }
  0x3e   :  { %1823 = vmatmul.mubr.msk.bf16.gmra.mrb[28].mxu0 %vm260_vm0, %v1946_v18 }
  0x3f   :  { %1826 = vmatprep.mubr.msk.bf16.mxu0 %vm260_vm0, %v1947_v19 }
  0x46   :  { %1827 = vmatmul.mubr.msk.bf16.gmra.mrb[32].mxu0 %vm260_vm0, %v1948_v20 }
  0x47   :  { %1830 = vmatprep.mubr.msk.bf16.mxu0 %vm260_vm0, %v1949_v21 }
  0x4e   :  { %1831 = vmatmul.mubr.msk.bf16.gmra.mrb[36].mxu0 %vm260_vm0, %v1950_v22 }
  0x4f   :  { %1834 = vmatprep.mubr.msk.bf16.mxu0 %vm260_vm0, %v1951_v23 }
  0x56   :  { %1835 = vmatmul.mubr.msk.bf16.gmra.mrb[40].mxu0 %vm260_vm0, %v1952_v24 }
  0x57   :  { %1838 = vmatprep.mubr.msk.bf16.mxu0 %vm260_vm0, %v1953_v25 }
  0x5e   :  { %1839 = vmatmul.mubr.msk.bf16.gmra.mrb[44].mxu0 %vm260_vm0, %v1954_v26 }
  0x5f   :  { %1842 = vmatprep.mubr.msk.bf16.mxu0 %vm260_vm0, %v1955_v28 }
  0x66   :  { %1843 = vmatmul.mubr.msk.bf16.gmra.mrb[48].mxu0 %vm260_vm0, %v1956_v30 }
  0x67   :  { %1846 = vmatprep.mubr.msk.bf16.mxu0 %vm260_vm0, %v1957_v31 }
  0x6e   :  { %1847 = vmatmul.mubr.msk.bf16.gmra.mrb[52].mxu0 %vm260_vm0, %v1958_v32 }
  0x6f   :  { %1850 = vmatprep.mubr.msk.bf16.mxu0 %vm260_vm0, %v1959_v33 }
  0x76   :  { %1851 = vmatmul.mubr.msk.bf16.gmra.mrb[56].mxu0 %vm260_vm0, %v1960_v34 }
  0x77   :  { %1854 = vmatprep.mubr.msk.bf16.mxu0 %vm260_vm0, %v1961_v35 }
  0x7e   :  { %1855 = vmatmul.mubr.msk.bf16.gmra.mrb[60].mxu0 %vm260_vm0, %v1962_v36 }
  0xd9   :  { %v1796_v38 = vpop.f32.mrb[0].mxu0 }
  0xda   :  { %v400_v39 = vadd.f32 %v1796_v38, %v2143_v37  ;;  %v391_v40 = vpop.f32.mrb[1].mxu0 }
  0xdb   :  { %v392_v41 = vadd.f32 %v2143_v37, %v391_v40  ;;  %v1797_v42 = vpop.f32.mrb[2].mxu0 }
  0xdc   :  { %v403_v43 = vadd.f32 %v1797_v42, %v2143_v37  ;;  %v394_v44 = vpop.f32.mrb[3].mxu0  ;;  %v648_v46 = vmax.f32 %v400_v39, 0.0 }
  0xdd   :  { %v395_v45 = vadd.f32 %v2143_v37, %v394_v44  ;;  %v646_v48 = vmax.f32 %v392_v41, 0.0 }
  0xde   :  { %v649_v47 = vmax.f32 %v403_v43, 0.0 }
  0xdf   :  { %v647_v49 = vmax.f32 %v395_v45, 0.0 }
  0xe0   :  { %v711_v50 = vpack.c.bf16 %v649_v47, %v648_v46 }
  0xe1   :  { %v1800_v51 = vpop.f32.mrb[4].mxu0  ;;  %v710_v52 = vpack.c.bf16 %v647_v49, %v646_v48 }
  0xe2   :  { %v416_v53 = vadd.f32 %v1800_v51, %v2143_v37  ;;  %v407_v54 = vpop.f32.mrb[5].mxu0 }
  0xe3   :  { %v408_v55 = vadd.f32 %v2143_v37, %v407_v54  ;;  %v1801_v56 = vpop.f32.mrb[6].mxu0  ;;  %1866 = vmatprep.mubr.msk.bf16.mxu1 %vm781_vm1, %v710_v52 }
  0xe4   :  { %v419_v57 = vadd.f32 %v1801_v56, %v2143_v37  ;;  %v410_v58 = vpop.f32.mrb[7].mxu0  ;;  %1867 = vmatmul.mubr.msk.bf16.vlgmr.msra.gmra.mrb[0].mxu1 %vm781_vm1, %v711_v50  ;;  %v652_v60 = vmax.f32 %v416_v53, 0.0 }
  0xe5   :  { %v411_v59 = vadd.f32 %v2143_v37, %v410_v58  ;;  %v650_v62 = vmax.f32 %v408_v55, 0.0 }
  0xe6   :  { %v653_v61 = vmax.f32 %v419_v57, 0.0 }
  0xe7   :  { %v651_v63 = vmax.f32 %v411_v59, 0.0 }
  0xe8   :  { %v713_v0 = vpack.c.bf16 %v653_v61, %v652_v60 }
  0xe9   :  { %v712_v1 = vpack.c.bf16 %v651_v63, %v650_v62  ;;  %v1804_v2 = vpop.f32.mrb[8].mxu0 }
  0xea   :  { %v432_v3 = vadd.f32 %v1804_v2, %v2143_v37  ;;  %v423_v4 = vpop.f32.mrb[9].mxu0 }
  0xeb   :  { %v424_v5 = vadd.f32 %v2143_v37, %v423_v4  ;;  %v1805_v6 = vpop.f32.mrb[10].mxu0  ;;  %1870 = vmatprep.mubr.msk.bf16.mxu1 %vm781_vm1, %v712_v1 }
  0xec   :  { %v435_v7 = vadd.f32 %v1805_v6, %v2143_v37  ;;  %v426_v8 = vpop.f32.mrb[11].mxu0  ;;  %1871 = vmatmul.mubr.msk.bf16.gmra.mrb[4].mxu1 %vm781_vm1, %v713_v0  ;;  %v656_v10 = vmax.f32 %v432_v3, 0.0 }
  0xed   :  { %v427_v9 = vadd.f32 %v2143_v37, %v426_v8  ;;  %v654_v12 = vmax.f32 %v424_v5, 0.0 }
  0xee   :  { %v657_v11 = vmax.f32 %v435_v7, 0.0 }
  0xef   :  { %v655_v13 = vmax.f32 %v427_v9, 0.0 }
  0xf0   :  { %v715_v14 = vpack.c.bf16 %v657_v11, %v656_v10 }
  0xf1   :  { %v714_v15 = vpack.c.bf16 %v655_v13, %v654_v12  ;;  %v1808_v16 = vpop.f32.mrb[12].mxu0 }
  0xf2   :  { %v448_v17 = vadd.f32 %v1808_v16, %v2143_v37  ;;  %v439_v18 = vpop.f32.mrb[13].mxu0 }
  0xf3   :  { %v440_v19 = vadd.f32 %v2143_v37, %v439_v18  ;;  %v1809_v20 = vpop.f32.mrb[14].mxu0  ;;  %1874 = vmatprep.mubr.msk.bf16.mxu1 %vm781_vm1, %v714_v15 }
  0xf4   :  { %v451_v21 = vadd.f32 %v1809_v20, %v2143_v37  ;;  %v442_v22 = vpop.f32.mrb[15].mxu0  ;;  %1875 = vmatmul.mubr.msk.bf16.gmra.mrb[8].mxu1 %vm781_vm1, %v715_v14  ;;  %v660_v24 = vmax.f32 %v448_v17, 0.0 }
  0xf5   :  { %v443_v23 = vadd.f32 %v2143_v37, %v442_v22  ;;  %v658_v26 = vmax.f32 %v440_v19, 0.0 }
  0xf6   :  { %v661_v25 = vmax.f32 %v451_v21, 0.0 }
  0xf7   :  { %v659_v27 = vmax.f32 %v443_v23, 0.0 }
  0xf8   :  { %v717_v28 = vpack.c.bf16 %v661_v25, %v660_v24 }
  0xf9   :  { %v716_v29 = vpack.c.bf16 %v659_v27, %v658_v26  ;;  %v1812_v30 = vpop.f32.mrb[16].mxu0 }
  0xfa   :  { %v464_v31 = vadd.f32 %v1812_v30, %v2143_v37  ;;  %v455_v32 = vpop.f32.mrb[17].mxu0 }
  0xfb   :  { %v456_v33 = vadd.f32 %v2143_v37, %v455_v32  ;;  %v1813_v34 = vpop.f32.mrb[18].mxu0  ;;  %1878 = vmatprep.mubr.msk.bf16.mxu1 %vm781_vm1, %v716_v29 }
  0xfc   :  { %v467_v35 = vadd.f32 %v1813_v34, %v2143_v37  ;;  %v458_v36 = vpop.f32.mrb[19].mxu0  ;;  %1879 = vmatmul.mubr.msk.bf16.gmra.mrb[12].mxu1 %vm781_vm1, %v717_v28  ;;  %v664_v39 = vmax.f32 %v464_v31, 0.0 }
  0xfd   :  { %v459_v38 = vadd.f32 %v2143_v37, %v458_v36  ;;  %v662_v41 = vmax.f32 %v456_v33, 0.0 }
  0xfe   :  { %v665_v40 = vmax.f32 %v467_v35, 0.0 }
  0xff   :  { %v663_v42 = vmax.f32 %v459_v38, 0.0 }
 0x100   :  { %v719_v43 = vpack.c.bf16 %v665_v40, %v664_v39 }
 0x101   :  { %v718_v44 = vpack.c.bf16 %v663_v42, %v662_v41  ;;  %v1816_v45 = vpop.f32.mrb[20].mxu0 }
 0x102   :  { %v480_v46 = vadd.f32 %v1816_v45, %v2143_v37  ;;  %v471_v47 = vpop.f32.mrb[21].mxu0 }
 0x103   :  { %v472_v48 = vadd.f32 %v2143_v37, %v471_v47  ;;  %v1817_v49 = vpop.f32.mrb[22].mxu0  ;;  %1882 = vmatprep.mubr.msk.bf16.mxu1 %vm781_vm1, %v718_v44 }
 0x104   :  { %v483_v50 = vadd.f32 %v1817_v49, %v2143_v37  ;;  %v474_v51 = vpop.f32.mrb[23].mxu0  ;;  %1883 = vmatmul.mubr.msk.bf16.gmra.mrb[16].mxu1 %vm781_vm1, %v719_v43  ;;  %v668_v53 = vmax.f32 %v480_v46, 0.0 }
 0x105   :  { %v475_v52 = vadd.f32 %v2143_v37, %v474_v51  ;;  %v666_v55 = vmax.f32 %v472_v48, 0.0 }
 0x106   :  { %v669_v54 = vmax.f32 %v483_v50, 0.0 }
 0x107   :  { %v667_v56 = vmax.f32 %v475_v52, 0.0 }
 0x108   :  { %v721_v57 = vpack.c.bf16 %v669_v54, %v668_v53 }
 0x109   :  { %v720_v58 = vpack.c.bf16 %v667_v56, %v666_v55  ;;  %v1820_v59 = vpop.f32.mrb[24].mxu0 }
 0x10a   :  { %v496_v60 = vadd.f32 %v1820_v59, %v2143_v37  ;;  %v487_v61 = vpop.f32.mrb[25].mxu0 }
 0x10b   :  { %v488_v62 = vadd.f32 %v2143_v37, %v487_v61  ;;  %v1821_v63 = vpop.f32.mrb[26].mxu0  ;;  %1886 = vmatprep.mubr.msk.bf16.mxu1 %vm781_vm1, %v720_v58 }
 0x10c   :  { %v499_v0 = vadd.f32 %v1821_v63, %v2143_v37  ;;  %v490_v1 = vpop.f32.mrb[27].mxu0  ;;  %1887 = vmatmul.mubr.msk.bf16.gmra.mrb[20].mxu1 %vm781_vm1, %v721_v57  ;;  %v672_v3 = vmax.f32 %v496_v60, 0.0 }
 0x10d   :  { %v491_v2 = vadd.f32 %v2143_v37, %v490_v1  ;;  %v670_v5 = vmax.f32 %v488_v62, 0.0 }
 0x10e   :  { %v673_v4 = vmax.f32 %v499_v0, 0.0 }
 0x10f   :  { %v671_v6 = vmax.f32 %v491_v2, 0.0 }
 0x110   :  { %v723_v7 = vpack.c.bf16 %v673_v4, %v672_v3 }
 0x111   :  { %v722_v8 = vpack.c.bf16 %v671_v6, %v670_v5  ;;  %v1824_v9 = vpop.f32.mrb[28].mxu0 }
 0x112   :  { %v512_v10 = vadd.f32 %v1824_v9, %v2143_v37  ;;  %v503_v11 = vpop.f32.mrb[29].mxu0 }
 0x113   :  { %v504_v12 = vadd.f32 %v2143_v37, %v503_v11  ;;  %v1825_v13 = vpop.f32.mrb[30].mxu0  ;;  %1890 = vmatprep.mubr.msk.bf16.mxu1 %vm781_vm1, %v722_v8 }
 0x114   :  { %v515_v14 = vadd.f32 %v1825_v13, %v2143_v37  ;;  %v506_v15 = vpop.f32.mrb[31].mxu0  ;;  %1891 = vmatmul.mubr.msk.bf16.gmra.mrb[24].mxu1 %vm781_vm1, %v723_v7  ;;  %v676_v17 = vmax.f32 %v512_v10, 0.0 }
 0x115   :  { %v507_v16 = vadd.f32 %v2143_v37, %v506_v15  ;;  %v674_v19 = vmax.f32 %v504_v12, 0.0 }
 0x116   :  { %v677_v18 = vmax.f32 %v515_v14, 0.0 }
 0x117   :  { %v675_v20 = vmax.f32 %v507_v16, 0.0 }
 0x118   :  { %v725_v21 = vpack.c.bf16 %v677_v18, %v676_v17 }
 0x119   :  { %v724_v22 = vpack.c.bf16 %v675_v20, %v674_v19  ;;  %v1828_v23 = vpop.f32.mrb[32].mxu0 }
 0x11a   :  { %v528_v24 = vadd.f32 %v1828_v23, %v2143_v37  ;;  %v519_v25 = vpop.f32.mrb[33].mxu0 }
 0x11b   :  { %v520_v26 = vadd.f32 %v2143_v37, %v519_v25  ;;  %v1829_v27 = vpop.f32.mrb[34].mxu0  ;;  %1894 = vmatprep.mubr.msk.bf16.mxu1 %vm781_vm1, %v724_v22 }
 0x11c   :  { %v531_v28 = vadd.f32 %v1829_v27, %v2143_v37  ;;  %v522_v29 = vpop.f32.mrb[35].mxu0  ;;  %1895 = vmatmul.mubr.msk.bf16.gmra.mrb[28].mxu1 %vm781_vm1, %v725_v21  ;;  %v680_v31 = vmax.f32 %v528_v24, 0.0 }
 0x11d   :  { %v523_v30 = vadd.f32 %v2143_v37, %v522_v29  ;;  %v678_v33 = vmax.f32 %v520_v26, 0.0 }
 0x11e   :  { %v681_v32 = vmax.f32 %v531_v28, 0.0 }
 0x11f   :  { %v679_v34 = vmax.f32 %v523_v30, 0.0 }
 0x120   :  { %v727_v35 = vpack.c.bf16 %v681_v32, %v680_v31 }
 0x121   :  { %v726_v36 = vpack.c.bf16 %v679_v34, %v678_v33  ;;  %v1832_v38 = vpop.f32.mrb[36].mxu0 }
 0x122   :  { %v544_v39 = vadd.f32 %v1832_v38, %v2143_v37  ;;  %v535_v40 = vpop.f32.mrb[37].mxu0 }
 0x123   :  { %v536_v41 = vadd.f32 %v2143_v37, %v535_v40  ;;  %v1833_v42 = vpop.f32.mrb[38].mxu0  ;;  %1898 = vmatprep.mubr.msk.bf16.mxu1 %vm781_vm1, %v726_v36 }
 0x124   :  { %v547_v43 = vadd.f32 %v1833_v42, %v2143_v37  ;;  %v538_v44 = vpop.f32.mrb[39].mxu0  ;;  %1899 = vmatmul.mubr.msk.bf16.gmra.mrb[32].mxu1 %vm781_vm1, %v727_v35  ;;  %v684_v46 = vmax.f32 %v544_v39, 0.0 }
 0x125   :  { %v539_v45 = vadd.f32 %v2143_v37, %v538_v44  ;;  %v682_v48 = vmax.f32 %v536_v41, 0.0 }
 0x126   :  { %v685_v47 = vmax.f32 %v547_v43, 0.0 }
 0x127   :  { %v683_v49 = vmax.f32 %v539_v45, 0.0 }
 0x128   :  { %v729_v50 = vpack.c.bf16 %v685_v47, %v684_v46 }
 0x129   :  { %v728_v51 = vpack.c.bf16 %v683_v49, %v682_v48  ;;  %v1836_v52 = vpop.f32.mrb[40].mxu0 }
 0x12a   :  { %v560_v53 = vadd.f32 %v1836_v52, %v2143_v37  ;;  %v551_v54 = vpop.f32.mrb[41].mxu0 }
 0x12b   :  { %v552_v55 = vadd.f32 %v2143_v37, %v551_v54  ;;  %v1837_v56 = vpop.f32.mrb[42].mxu0  ;;  %1902 = vmatprep.mubr.msk.bf16.mxu1 %vm781_vm1, %v728_v51 }
 0x12c   :  { %v563_v57 = vadd.f32 %v1837_v56, %v2143_v37  ;;  %v554_v58 = vpop.f32.mrb[43].mxu0  ;;  %1903 = vmatmul.mubr.msk.bf16.gmra.mrb[36].mxu1 %vm781_vm1, %v729_v50  ;;  %v688_v60 = vmax.f32 %v560_v53, 0.0 }
 0x12d   :  { %v555_v59 = vadd.f32 %v2143_v37, %v554_v58  ;;  %v686_v62 = vmax.f32 %v552_v55, 0.0 }
 0x12e   :  { %v689_v61 = vmax.f32 %v563_v57, 0.0 }
 0x12f   :  { %v687_v63 = vmax.f32 %v555_v59, 0.0 }
 0x130   :  { %v731_v0 = vpack.c.bf16 %v689_v61, %v688_v60 }
 0x131   :  { %v730_v1 = vpack.c.bf16 %v687_v63, %v686_v62  ;;  %v1840_v2 = vpop.f32.mrb[44].mxu0 }
 0x132   :  { %v576_v3 = vadd.f32 %v1840_v2, %v2143_v37  ;;  %v567_v4 = vpop.f32.mrb[45].mxu0 }
 0x133   :  { %v568_v5 = vadd.f32 %v2143_v37, %v567_v4  ;;  %v1841_v6 = vpop.f32.mrb[46].mxu0  ;;  %1906 = vmatprep.mubr.msk.bf16.mxu1 %vm781_vm1, %v730_v1 }
 0x134   :  { %v579_v7 = vadd.f32 %v1841_v6, %v2143_v37  ;;  %v570_v8 = vpop.f32.mrb[47].mxu0  ;;  %1907 = vmatmul.mubr.msk.bf16.gmra.mrb[40].mxu1 %vm781_vm1, %v731_v0  ;;  %v692_v10 = vmax.f32 %v576_v3, 0.0 }
 0x135   :  { %v571_v9 = vadd.f32 %v2143_v37, %v570_v8  ;;  %v690_v12 = vmax.f32 %v568_v5, 0.0 }
 0x136   :  { %v693_v11 = vmax.f32 %v579_v7, 0.0 }
 0x137   :  { %v691_v13 = vmax.f32 %v571_v9, 0.0  ;;  %v2244_v9 = vld [vmem:[%s2570_s4] ss:$0 sm:$0xff] }
 0x138   :  { %v733_v14 = vpack.c.bf16 %v693_v11, %v692_v10 }
 0x139   :  { %v732_v15 = vpack.c.bf16 %v691_v13, %v690_v12  ;;  %v1844_v16 = vpop.f32.mrb[48].mxu0 }
 0x13a   :  { %v592_v17 = vadd.f32 %v1844_v16, %v2143_v37  ;;  %v583_v18 = vpop.f32.mrb[49].mxu0 }
 0x13b   :  { %v584_v19 = vadd.f32 %v2143_v37, %v583_v18  ;;  %v1845_v20 = vpop.f32.mrb[50].mxu0  ;;  %1910 = vmatprep.mubr.msk.bf16.mxu1 %vm781_vm1, %v732_v15 }
 0x13c   :  { %v595_v21 = vadd.f32 %v1845_v20, %v2143_v37  ;;  %v586_v22 = vpop.f32.mrb[51].mxu0  ;;  %1911 = vmatmul.mubr.msk.bf16.gmra.mrb[44].mxu1 %vm781_vm1, %v733_v14  ;;  %v696_v24 = vmax.f32 %v592_v17, 0.0 }
 0x13d   :  { %v587_v23 = vadd.f32 %v2143_v37, %v586_v22  ;;  %v694_v26 = vmax.f32 %v584_v19, 0.0 }
 0x13e   :  { %v697_v25 = vmax.f32 %v595_v21, 0.0 }
 0x13f   :  { %v695_v27 = vmax.f32 %v587_v23, 0.0 }
 0x140   :  { %v735_v28 = vpack.c.bf16 %v697_v25, %v696_v24 }
 0x141   :  { %v734_v29 = vpack.c.bf16 %v695_v27, %v694_v26  ;;  %v1848_v30 = vpop.f32.mrb[52].mxu0 }
 0x142   :  { %v608_v31 = vadd.f32 %v1848_v30, %v2143_v37  ;;  %v599_v32 = vpop.f32.mrb[53].mxu0 }
 0x143   :  { %v600_v33 = vadd.f32 %v2143_v37, %v599_v32  ;;  %v1849_v34 = vpop.f32.mrb[54].mxu0  ;;  %1914 = vmatprep.mubr.msk.bf16.mxu1 %vm781_vm1, %v734_v29 }
 0x144   :  { %v611_v35 = vadd.f32 %v1849_v34, %v2143_v37  ;;  %v602_v36 = vpop.f32.mrb[55].mxu0  ;;  %1915 = vmatmul.mubr.msk.bf16.gmra.mrb[48].mxu1 %vm781_vm1, %v735_v28  ;;  %v700_v39 = vmax.f32 %v608_v31, 0.0 }
 0x145   :  { %v603_v38 = vadd.f32 %v2143_v37, %v602_v36  ;;  %v698_v41 = vmax.f32 %v600_v33, 0.0 }
 0x146   :  { %v701_v40 = vmax.f32 %v611_v35, 0.0 }
 0x147   :  { %v699_v42 = vmax.f32 %v603_v38, 0.0 }
 0x148   :  { %v737_v43 = vpack.c.bf16 %v701_v40, %v700_v39 }
 0x149   :  { %v736_v44 = vpack.c.bf16 %v699_v42, %v698_v41  ;;  %v1852_v45 = vpop.f32.mrb[56].mxu0 }
 0x14a   :  { %v624_v46 = vadd.f32 %v1852_v45, %v2143_v37  ;;  %v615_v47 = vpop.f32.mrb[57].mxu0 }
 0x14b   :  { %v616_v48 = vadd.f32 %v2143_v37, %v615_v47  ;;  %v1853_v49 = vpop.f32.mrb[58].mxu0  ;;  %1918 = vmatprep.mubr.msk.bf16.mxu1 %vm781_vm1, %v736_v44 }
 0x14c   :  { %v627_v50 = vadd.f32 %v1853_v49, %v2143_v37  ;;  %v618_v51 = vpop.f32.mrb[59].mxu0  ;;  %1919 = vmatmul.mubr.msk.bf16.gmra.mrb[52].mxu1 %vm781_vm1, %v737_v43  ;;  %v704_v53 = vmax.f32 %v624_v46, 0.0 }
 0x14d   :  { %v619_v52 = vadd.f32 %v2143_v37, %v618_v51  ;;  %v702_v55 = vmax.f32 %v616_v48, 0.0 }
 0x14e   :  { %v705_v54 = vmax.f32 %v627_v50, 0.0 }
 0x14f   :  { %v703_v56 = vmax.f32 %v619_v52, 0.0 }
 0x150   :  { %v739_v57 = vpack.c.bf16 %v705_v54, %v704_v53 }
 0x151   :  { %v738_v58 = vpack.c.bf16 %v703_v56, %v702_v55  ;;  %v1856_v59 = vpop.f32.mrb[60].mxu0 }
 0x152   :  { %v640_v60 = vadd.f32 %v1856_v59, %v2143_v37  ;;  %v631_v61 = vpop.f32.mrb[61].mxu0 }
 0x153   :  { %v632_v62 = vadd.f32 %v2143_v37, %v631_v61  ;;  %v1857_v63 = vpop.f32.mrb[62].mxu0  ;;  %1922 = vmatprep.mubr.msk.bf16.mxu1 %vm781_vm1, %v738_v58 }
 0x154   :  { %v643_v0 = vadd.f32 %v1857_v63, %v2143_v37  ;;  %v634_v1 = vpop.f32.mrb[63].mxu0  ;;  %1923 = vmatmul.mubr.msk.bf16.gmra.mrb[56].mxu1 %vm781_vm1, %v739_v57  ;;  %v708_v3 = vmax.f32 %v640_v60, 0.0 }
 0x155   :  { %v635_v2 = vadd.f32 %v2143_v37, %v634_v1  ;;  %v706_v5 = vmax.f32 %v632_v62, 0.0 }
 0x156   :  { %v709_v4 = vmax.f32 %v643_v0, 0.0 }
 0x157   :  { %v707_v6 = vmax.f32 %v635_v2, 0.0 }
 0x158   :  { %v741_v7 = vpack.c.bf16 %v709_v4, %v708_v3 }
 0x159   :  { %v740_v8 = vpack.c.bf16 %v707_v6, %v706_v5 }
 0x15b   :  { %1926 = vmatprep.mubr.msk.bf16.mxu1 %vm781_vm1, %v740_v8 }
 0x15c   :  { %1927 = vmatmul.mubr.msk.bf16.gmra.mrb[60].mxu1 %vm781_vm1, %v741_v7 }
 0x1b7   :  { %v1868_v10 = vpop.f32.mrb[0].mxu1 }
 0x1b8   :  { %v921_v11 = vadd.f32 %v1868_v10, %v2244_v9  ;;  %v912_v12 = vpop.f32.mrb[1].mxu1 }
 0x1b9   :  { %v913_v37 = vadd.f32 %v2244_v9, %v912_v12  ;;  %v1869_v13 = vpop.f32.mrb[2].mxu1 }
 0x1ba   :  { %v1661_v14 = vpack.c.bf16 %v921_v11, %v921_v11  ;;  %v924_v15 = vadd.f32 %v1869_v13, %v2244_v9  ;;  %v915_v16 = vpop.f32.mrb[3].mxu1 }
 0x1bb   :  { %v1659_v17 = vpack.c.bf16 %v913_v37, %v913_v37  ;;  %v916_v18 = vadd.f32 %v2244_v9, %v915_v16 }
 0x1bc   :  { %1426 = vst.msk [vmem:[%s2571_s5 + $0x8] sm:$0xf] %vm1423_vm2, %v1661_v14  ;;  %v1662_v19 = vpack.c.bf16 %v924_v15, %v924_v15 }
 0x1bd   :  { %1424 = vst.msk [vmem:[%s2571_s5] sm:$0xf] %vm1423_vm2, %v1659_v17  ;;  %v1660_v20 = vpack.c.bf16 %v916_v18, %v916_v18 }
 0x1be   :  { %1427 = vst.msk [vmem:[%s2571_s5 + $0xc] sm:$0xf] %vm1423_vm2, %v1662_v19 }
 0x1bf   :  { %1425 = vst.msk [vmem:[%s2571_s5 + $0x4] sm:$0xf] %vm1423_vm2, %v1660_v20  ;;  %v1872_v21 = vpop.f32.mrb[4].mxu1 }
 0x1c0   :  { %v937_v22 = vadd.f32 %v1872_v21, %v2244_v9  ;;  %v928_v23 = vpop.f32.mrb[5].mxu1 }
 0x1c1   :  { %v929_v24 = vadd.f32 %v2244_v9, %v928_v23  ;;  %v1873_v25 = vpop.f32.mrb[6].mxu1 }
 0x1c2   :  { %v1665_v26 = vpack.c.bf16 %v937_v22, %v937_v22  ;;  %v940_v27 = vadd.f32 %v1873_v25, %v2244_v9  ;;  %v931_v28 = vpop.f32.mrb[7].mxu1 }
 0x1c3   :  { %v1663_v29 = vpack.c.bf16 %v929_v24, %v929_v24  ;;  %v932_v30 = vadd.f32 %v2244_v9, %v931_v28 }
 0x1c4   :  { %1430 = vst.msk [vmem:[%s2571_s5 + $0x18] sm:$0xf] %vm1423_vm2, %v1665_v26  ;;  %v1666_v31 = vpack.c.bf16 %v940_v27, %v940_v27 }
 0x1c5   :  { %1428 = vst.msk [vmem:[%s2571_s5 + $0x10] sm:$0xf] %vm1423_vm2, %v1663_v29  ;;  %v1664_v32 = vpack.c.bf16 %v932_v30, %v932_v30 }
 0x1c6   :  { %1431 = vst.msk [vmem:[%s2571_s5 + $0x1c] sm:$0xf] %vm1423_vm2, %v1666_v31 }
 0x1c7   :  { %1429 = vst.msk [vmem:[%s2571_s5 + $0x14] sm:$0xf] %vm1423_vm2, %v1664_v32  ;;  %v1876_v33 = vpop.f32.mrb[8].mxu1 }
 0x1c8   :  { %v953_v34 = vadd.f32 %v1876_v33, %v2244_v9  ;;  %v944_v35 = vpop.f32.mrb[9].mxu1 }
 0x1c9   :  { %v945_v36 = vadd.f32 %v2244_v9, %v944_v35  ;;  %v1877_v38 = vpop.f32.mrb[10].mxu1 }
 0x1ca   :  { %v1669_v39 = vpack.c.bf16 %v953_v34, %v953_v34  ;;  %v956_v40 = vadd.f32 %v1877_v38, %v2244_v9  ;;  %v947_v41 = vpop.f32.mrb[11].mxu1 }
 0x1cb   :  { %v1667_v42 = vpack.c.bf16 %v945_v36, %v945_v36  ;;  %v948_v43 = vadd.f32 %v2244_v9, %v947_v41 }
 0x1cc   :  { %1434 = vst.msk [vmem:[%s2571_s5 + $0x28] sm:$0xf] %vm1423_vm2, %v1669_v39  ;;  %v1670_v44 = vpack.c.bf16 %v956_v40, %v956_v40 }
 0x1cd   :  { %1432 = vst.msk [vmem:[%s2571_s5 + $0x20] sm:$0xf] %vm1423_vm2, %v1667_v42  ;;  %v1668_v45 = vpack.c.bf16 %v948_v43, %v948_v43 }
 0x1ce   :  { %1435 = vst.msk [vmem:[%s2571_s5 + $0x2c] sm:$0xf] %vm1423_vm2, %v1670_v44 }
 0x1cf   :  { %1433 = vst.msk [vmem:[%s2571_s5 + $0x24] sm:$0xf] %vm1423_vm2, %v1668_v45  ;;  %v1880_v46 = vpop.f32.mrb[12].mxu1 }
 0x1d0   :  { %v969_v47 = vadd.f32 %v1880_v46, %v2244_v9  ;;  %v960_v48 = vpop.f32.mrb[13].mxu1 }
 0x1d1   :  { %v961_v49 = vadd.f32 %v2244_v9, %v960_v48  ;;  %v1881_v50 = vpop.f32.mrb[14].mxu1 }
 0x1d2   :  { %v1673_v51 = vpack.c.bf16 %v969_v47, %v969_v47  ;;  %v972_v52 = vadd.f32 %v1881_v50, %v2244_v9  ;;  %v963_v53 = vpop.f32.mrb[15].mxu1 }
 0x1d3   :  { %v1671_v54 = vpack.c.bf16 %v961_v49, %v961_v49  ;;  %v964_v55 = vadd.f32 %v2244_v9, %v963_v53 }
 0x1d4   :  { %1438 = vst.msk [vmem:[%s2571_s5 + $0x38] sm:$0xf] %vm1423_vm2, %v1673_v51  ;;  %v1674_v56 = vpack.c.bf16 %v972_v52, %v972_v52 }
 0x1d5   :  { %1436 = vst.msk [vmem:[%s2571_s5 + $0x30] sm:$0xf] %vm1423_vm2, %v1671_v54  ;;  %v1672_v57 = vpack.c.bf16 %v964_v55, %v964_v55 }
 0x1d6   :  { %1439 = vst.msk [vmem:[%s2571_s5 + $0x3c] sm:$0xf] %vm1423_vm2, %v1674_v56 }
 0x1d7   :  { %1437 = vst.msk [vmem:[%s2571_s5 + $0x34] sm:$0xf] %vm1423_vm2, %v1672_v57  ;;  %v1884_v58 = vpop.f32.mrb[16].mxu1 }
 0x1d8   :  { %v985_v59 = vadd.f32 %v1884_v58, %v2244_v9  ;;  %v976_v60 = vpop.f32.mrb[17].mxu1 }
 0x1d9   :  { %v977_v61 = vadd.f32 %v2244_v9, %v976_v60  ;;  %v1885_v62 = vpop.f32.mrb[18].mxu1 }
 0x1da   :  { %v1677_v63 = vpack.c.bf16 %v985_v59, %v985_v59  ;;  %v988_v0 = vadd.f32 %v1885_v62, %v2244_v9  ;;  %v979_v1 = vpop.f32.mrb[19].mxu1 }
 0x1db   :  { %v1675_v2 = vpack.c.bf16 %v977_v61, %v977_v61  ;;  %v980_v3 = vadd.f32 %v2244_v9, %v979_v1 }
 0x1dc   :  { %1442 = vst.msk [vmem:[%s2571_s5 + $0x48] sm:$0xf] %vm1423_vm2, %v1677_v63  ;;  %v1678_v4 = vpack.c.bf16 %v988_v0, %v988_v0 }
 0x1dd   :  { %1440 = vst.msk [vmem:[%s2571_s5 + $0x40] sm:$0xf] %vm1423_vm2, %v1675_v2  ;;  %v1676_v5 = vpack.c.bf16 %v980_v3, %v980_v3 }
 0x1de   :  { %1443 = vst.msk [vmem:[%s2571_s5 + $0x4c] sm:$0xf] %vm1423_vm2, %v1678_v4 }
 0x1df   :  { %1441 = vst.msk [vmem:[%s2571_s5 + $0x44] sm:$0xf] %vm1423_vm2, %v1676_v5  ;;  %v1888_v6 = vpop.f32.mrb[20].mxu1 }
 0x1e0   :  { %v1001_v7 = vadd.f32 %v1888_v6, %v2244_v9  ;;  %v992_v8 = vpop.f32.mrb[21].mxu1 }
 0x1e1   :  { %v993_v10 = vadd.f32 %v2244_v9, %v992_v8  ;;  %v1889_v11 = vpop.f32.mrb[22].mxu1 }
 0x1e2   :  { %v1681_v12 = vpack.c.bf16 %v1001_v7, %v1001_v7  ;;  %v1004_v37 = vadd.f32 %v1889_v11, %v2244_v9  ;;  %v995_v13 = vpop.f32.mrb[23].mxu1 }
 0x1e3   :  { %v1679_v14 = vpack.c.bf16 %v993_v10, %v993_v10  ;;  %v996_v15 = vadd.f32 %v2244_v9, %v995_v13 }
 0x1e4   :  { %1446 = vst.msk [vmem:[%s2571_s5 + $0x58] sm:$0xf] %vm1423_vm2, %v1681_v12  ;;  %v1682_v16 = vpack.c.bf16 %v1004_v37, %v1004_v37 }
 0x1e5   :  { %1444 = vst.msk [vmem:[%s2571_s5 + $0x50] sm:$0xf] %vm1423_vm2, %v1679_v14  ;;  %v1680_v17 = vpack.c.bf16 %v996_v15, %v996_v15 }
 0x1e6   :  { %1447 = vst.msk [vmem:[%s2571_s5 + $0x5c] sm:$0xf] %vm1423_vm2, %v1682_v16 }
 0x1e7   :  { %1445 = vst.msk [vmem:[%s2571_s5 + $0x54] sm:$0xf] %vm1423_vm2, %v1680_v17  ;;  %v1892_v18 = vpop.f32.mrb[24].mxu1 }
 0x1e8   :  { %v1017_v19 = vadd.f32 %v1892_v18, %v2244_v9  ;;  %v1008_v20 = vpop.f32.mrb[25].mxu1 }
 0x1e9   :  { %v1009_v21 = vadd.f32 %v2244_v9, %v1008_v20  ;;  %v1893_v22 = vpop.f32.mrb[26].mxu1 }
 0x1ea   :  { %v1685_v23 = vpack.c.bf16 %v1017_v19, %v1017_v19  ;;  %v1020_v24 = vadd.f32 %v1893_v22, %v2244_v9  ;;  %v1011_v25 = vpop.f32.mrb[27].mxu1 }
 0x1eb   :  { %v1683_v26 = vpack.c.bf16 %v1009_v21, %v1009_v21  ;;  %v1012_v27 = vadd.f32 %v2244_v9, %v1011_v25 }
 0x1ec   :  { %1450 = vst.msk [vmem:[%s2571_s5 + $0x68] sm:$0xf] %vm1423_vm2, %v1685_v23  ;;  %v1686_v28 = vpack.c.bf16 %v1020_v24, %v1020_v24 }
 0x1ed   :  { %1448 = vst.msk [vmem:[%s2571_s5 + $0x60] sm:$0xf] %vm1423_vm2, %v1683_v26  ;;  %v1684_v29 = vpack.c.bf16 %v1012_v27, %v1012_v27 }
 0x1ee   :  { %1451 = vst.msk [vmem:[%s2571_s5 + $0x6c] sm:$0xf] %vm1423_vm2, %v1686_v28 }
 0x1ef   :  { %1449 = vst.msk [vmem:[%s2571_s5 + $0x64] sm:$0xf] %vm1423_vm2, %v1684_v29  ;;  %v1896_v30 = vpop.f32.mrb[28].mxu1 }
 0x1f0   :  { %v1033_v31 = vadd.f32 %v1896_v30, %v2244_v9  ;;  %v1024_v32 = vpop.f32.mrb[29].mxu1 }
 0x1f1   :  { %v1025_v33 = vadd.f32 %v2244_v9, %v1024_v32  ;;  %v1897_v34 = vpop.f32.mrb[30].mxu1 }
 0x1f2   :  { %v1689_v35 = vpack.c.bf16 %v1033_v31, %v1033_v31  ;;  %v1036_v36 = vadd.f32 %v1897_v34, %v2244_v9  ;;  %v1027_v38 = vpop.f32.mrb[31].mxu1 }
 0x1f3   :  { %v1687_v39 = vpack.c.bf16 %v1025_v33, %v1025_v33  ;;  %v1028_v40 = vadd.f32 %v2244_v9, %v1027_v38 }
 0x1f4   :  { %1454 = vst.msk [vmem:[%s2571_s5 + $0x78] sm:$0xf] %vm1423_vm2, %v1689_v35  ;;  %v1690_v41 = vpack.c.bf16 %v1036_v36, %v1036_v36 }
 0x1f5   :  { %1452 = vst.msk [vmem:[%s2571_s5 + $0x70] sm:$0xf] %vm1423_vm2, %v1687_v39  ;;  %v1688_v42 = vpack.c.bf16 %v1028_v40, %v1028_v40 }
 0x1f6   :  { %1455 = vst.msk [vmem:[%s2571_s5 + $0x7c] sm:$0xf] %vm1423_vm2, %v1690_v41 }
 0x1f7   :  { %1453 = vst.msk [vmem:[%s2571_s5 + $0x74] sm:$0xf] %vm1423_vm2, %v1688_v42  ;;  %v1900_v43 = vpop.f32.mrb[32].mxu1 }
 0x1f8   :  { %v1049_v44 = vadd.f32 %v1900_v43, %v2244_v9  ;;  %v1040_v45 = vpop.f32.mrb[33].mxu1 }
 0x1f9   :  { %v1041_v46 = vadd.f32 %v2244_v9, %v1040_v45  ;;  %v1901_v47 = vpop.f32.mrb[34].mxu1 }
 0x1fa   :  { %v1693_v48 = vpack.c.bf16 %v1049_v44, %v1049_v44  ;;  %v1052_v49 = vadd.f32 %v1901_v47, %v2244_v9  ;;  %v1043_v50 = vpop.f32.mrb[35].mxu1 }
 0x1fb   :  { %v1691_v51 = vpack.c.bf16 %v1041_v46, %v1041_v46  ;;  %v1044_v52 = vadd.f32 %v2244_v9, %v1043_v50 }
 0x1fc   :  { %1458 = vst.msk [vmem:[%s2571_s5 + $0x88] sm:$0xf] %vm1423_vm2, %v1693_v48  ;;  %v1694_v53 = vpack.c.bf16 %v1052_v49, %v1052_v49 }
 0x1fd   :  { %1456 = vst.msk [vmem:[%s2571_s5 + $0x80] sm:$0xf] %vm1423_vm2, %v1691_v51  ;;  %v1692_v54 = vpack.c.bf16 %v1044_v52, %v1044_v52 }
 0x1fe   :  { %1459 = vst.msk [vmem:[%s2571_s5 + $0x8c] sm:$0xf] %vm1423_vm2, %v1694_v53 }
 0x1ff   :  { %1457 = vst.msk [vmem:[%s2571_s5 + $0x84] sm:$0xf] %vm1423_vm2, %v1692_v54  ;;  %v1904_v55 = vpop.f32.mrb[36].mxu1 }
 0x200   :  { %v1065_v56 = vadd.f32 %v1904_v55, %v2244_v9  ;;  %v1056_v57 = vpop.f32.mrb[37].mxu1 }
 0x201   :  { %v1057_v58 = vadd.f32 %v2244_v9, %v1056_v57  ;;  %v1905_v59 = vpop.f32.mrb[38].mxu1 }
 0x202   :  { %v1697_v60 = vpack.c.bf16 %v1065_v56, %v1065_v56  ;;  %v1068_v61 = vadd.f32 %v1905_v59, %v2244_v9  ;;  %v1059_v62 = vpop.f32.mrb[39].mxu1 }
 0x203   :  { %v1695_v63 = vpack.c.bf16 %v1057_v58, %v1057_v58  ;;  %v1060_v0 = vadd.f32 %v2244_v9, %v1059_v62 }
 0x204   :  { %1462 = vst.msk [vmem:[%s2571_s5 + $0x98] sm:$0xf] %vm1423_vm2, %v1697_v60  ;;  %v1698_v1 = vpack.c.bf16 %v1068_v61, %v1068_v61 }
 0x205   :  { %1460 = vst.msk [vmem:[%s2571_s5 + $0x90] sm:$0xf] %vm1423_vm2, %v1695_v63  ;;  %v1696_v2 = vpack.c.bf16 %v1060_v0, %v1060_v0 }
 0x206   :  { %1463 = vst.msk [vmem:[%s2571_s5 + $0x9c] sm:$0xf] %vm1423_vm2, %v1698_v1 }
 0x207   :  { %1461 = vst.msk [vmem:[%s2571_s5 + $0x94] sm:$0xf] %vm1423_vm2, %v1696_v2  ;;  %v1908_v3 = vpop.f32.mrb[40].mxu1 }
 0x208   :  { %v1081_v4 = vadd.f32 %v1908_v3, %v2244_v9  ;;  %v1072_v5 = vpop.f32.mrb[41].mxu1 }
 0x209   :  { %v1073_v6 = vadd.f32 %v2244_v9, %v1072_v5  ;;  %v1909_v7 = vpop.f32.mrb[42].mxu1 }
 0x20a   :  { %v1701_v8 = vpack.c.bf16 %v1081_v4, %v1081_v4  ;;  %v1084_v10 = vadd.f32 %v1909_v7, %v2244_v9  ;;  %v1075_v11 = vpop.f32.mrb[43].mxu1 }
 0x20b   :  { %v1699_v12 = vpack.c.bf16 %v1073_v6, %v1073_v6  ;;  %v1076_v37 = vadd.f32 %v2244_v9, %v1075_v11 }
 0x20c   :  { %1466 = vst.msk [vmem:[%s2571_s5 + $0xa8] sm:$0xf] %vm1423_vm2, %v1701_v8  ;;  %v1702_v13 = vpack.c.bf16 %v1084_v10, %v1084_v10 }
 0x20d   :  { %1464 = vst.msk [vmem:[%s2571_s5 + $0xa0] sm:$0xf] %vm1423_vm2, %v1699_v12  ;;  %v1700_v14 = vpack.c.bf16 %v1076_v37, %v1076_v37 }
 0x20e   :  { %1467 = vst.msk [vmem:[%s2571_s5 + $0xac] sm:$0xf] %vm1423_vm2, %v1702_v13 }
 0x20f   :  { %1465 = vst.msk [vmem:[%s2571_s5 + $0xa4] sm:$0xf] %vm1423_vm2, %v1700_v14  ;;  %v1912_v15 = vpop.f32.mrb[44].mxu1 }
 0x210   :  { %v1097_v16 = vadd.f32 %v1912_v15, %v2244_v9  ;;  %v1088_v17 = vpop.f32.mrb[45].mxu1 }
 0x211   :  { %v1089_v18 = vadd.f32 %v2244_v9, %v1088_v17  ;;  %v1913_v19 = vpop.f32.mrb[46].mxu1 }
 0x212   :  { %v1705_v20 = vpack.c.bf16 %v1097_v16, %v1097_v16  ;;  %v1100_v21 = vadd.f32 %v1913_v19, %v2244_v9  ;;  %v1091_v22 = vpop.f32.mrb[47].mxu1 }
 0x213   :  { %v1703_v23 = vpack.c.bf16 %v1089_v18, %v1089_v18  ;;  %v1092_v24 = vadd.f32 %v2244_v9, %v1091_v22 }
 0x214   :  { %1470 = vst.msk [vmem:[%s2571_s5 + $0xb8] sm:$0xf] %vm1423_vm2, %v1705_v20  ;;  %v1706_v25 = vpack.c.bf16 %v1100_v21, %v1100_v21 }
 0x215   :  { %1468 = vst.msk [vmem:[%s2571_s5 + $0xb0] sm:$0xf] %vm1423_vm2, %v1703_v23  ;;  %v1704_v26 = vpack.c.bf16 %v1092_v24, %v1092_v24 }
 0x216   :  { %1471 = vst.msk [vmem:[%s2571_s5 + $0xbc] sm:$0xf] %vm1423_vm2, %v1706_v25 }
 0x217   :  { %1469 = vst.msk [vmem:[%s2571_s5 + $0xb4] sm:$0xf] %vm1423_vm2, %v1704_v26  ;;  %v1916_v27 = vpop.f32.mrb[48].mxu1 }
 0x218   :  { %v1113_v28 = vadd.f32 %v1916_v27, %v2244_v9  ;;  %v1104_v29 = vpop.f32.mrb[49].mxu1 }
 0x219   :  { %v1105_v30 = vadd.f32 %v2244_v9, %v1104_v29  ;;  %v1917_v31 = vpop.f32.mrb[50].mxu1 }
 0x21a   :  { %v1709_v32 = vpack.c.bf16 %v1113_v28, %v1113_v28  ;;  %v1116_v33 = vadd.f32 %v1917_v31, %v2244_v9  ;;  %v1107_v34 = vpop.f32.mrb[51].mxu1 }
 0x21b   :  { %v1707_v35 = vpack.c.bf16 %v1105_v30, %v1105_v30  ;;  %v1108_v36 = vadd.f32 %v2244_v9, %v1107_v34 }
 0x21c   :  { %1474 = vst.msk [vmem:[%s2571_s5 + $0xc8] sm:$0xf] %vm1423_vm2, %v1709_v32  ;;  %v1710_v38 = vpack.c.bf16 %v1116_v33, %v1116_v33 }
 0x21d   :  { %1472 = vst.msk [vmem:[%s2571_s5 + $0xc0] sm:$0xf] %vm1423_vm2, %v1707_v35  ;;  %v1708_v39 = vpack.c.bf16 %v1108_v36, %v1108_v36 }
 0x21e   :  { %1475 = vst.msk [vmem:[%s2571_s5 + $0xcc] sm:$0xf] %vm1423_vm2, %v1710_v38 }
 0x21f   :  { %1473 = vst.msk [vmem:[%s2571_s5 + $0xc4] sm:$0xf] %vm1423_vm2, %v1708_v39  ;;  %v1920_v40 = vpop.f32.mrb[52].mxu1 }
 0x220   :  { %v1129_v41 = vadd.f32 %v1920_v40, %v2244_v9  ;;  %v1120_v42 = vpop.f32.mrb[53].mxu1 }
 0x221   :  { %v1121_v43 = vadd.f32 %v2244_v9, %v1120_v42  ;;  %v1921_v44 = vpop.f32.mrb[54].mxu1 }
 0x222   :  { %v1713_v45 = vpack.c.bf16 %v1129_v41, %v1129_v41  ;;  %v1132_v46 = vadd.f32 %v1921_v44, %v2244_v9  ;;  %v1123_v47 = vpop.f32.mrb[55].mxu1 }
 0x223   :  { %v1711_v48 = vpack.c.bf16 %v1121_v43, %v1121_v43  ;;  %v1124_v49 = vadd.f32 %v2244_v9, %v1123_v47 }
 0x224   :  { %1478 = vst.msk [vmem:[%s2571_s5 + $0xd8] sm:$0xf] %vm1423_vm2, %v1713_v45  ;;  %v1714_v50 = vpack.c.bf16 %v1132_v46, %v1132_v46 }
 0x225   :  { %1476 = vst.msk [vmem:[%s2571_s5 + $0xd0] sm:$0xf] %vm1423_vm2, %v1711_v48  ;;  %v1712_v51 = vpack.c.bf16 %v1124_v49, %v1124_v49 }
 0x226   :  { %1479 = vst.msk [vmem:[%s2571_s5 + $0xdc] sm:$0xf] %vm1423_vm2, %v1714_v50 }
 0x227   :  { %1477 = vst.msk [vmem:[%s2571_s5 + $0xd4] sm:$0xf] %vm1423_vm2, %v1712_v51  ;;  %v1924_v52 = vpop.f32.mrb[56].mxu1 }
 0x228   :  { %v1145_v53 = vadd.f32 %v1924_v52, %v2244_v9  ;;  %v1136_v54 = vpop.f32.mrb[57].mxu1 }
 0x229   :  { %v1137_v55 = vadd.f32 %v2244_v9, %v1136_v54  ;;  %v1925_v56 = vpop.f32.mrb[58].mxu1 }
 0x22a   :  { %v1717_v57 = vpack.c.bf16 %v1145_v53, %v1145_v53  ;;  %v1148_v58 = vadd.f32 %v1925_v56, %v2244_v9  ;;  %v1139_v59 = vpop.f32.mrb[59].mxu1 }
 0x22b   :  { %v1715_v60 = vpack.c.bf16 %v1137_v55, %v1137_v55  ;;  %v1140_v61 = vadd.f32 %v2244_v9, %v1139_v59 }
 0x22c   :  { %1482 = vst.msk [vmem:[%s2571_s5 + $0xe8] sm:$0xf] %vm1423_vm2, %v1717_v57  ;;  %v1718_v62 = vpack.c.bf16 %v1148_v58, %v1148_v58 }
 0x22d   :  { %1480 = vst.msk [vmem:[%s2571_s5 + $0xe0] sm:$0xf] %vm1423_vm2, %v1715_v60  ;;  %v1716_v63 = vpack.c.bf16 %v1140_v61, %v1140_v61 }
 0x22e   :  { %1483 = vst.msk [vmem:[%s2571_s5 + $0xec] sm:$0xf] %vm1423_vm2, %v1718_v62 }
 0x22f   :  { %1481 = vst.msk [vmem:[%s2571_s5 + $0xe4] sm:$0xf] %vm1423_vm2, %v1716_v63  ;;  %v1928_v0 = vpop.f32.mrb[60].mxu1 }
 0x230   :  { %v1161_v1 = vadd.f32 %v1928_v0, %v2244_v9  ;;  %v1152_v2 = vpop.f32.mrb[61].mxu1 }
 0x231   :  { %v1153_v3 = vadd.f32 %v2244_v9, %v1152_v2  ;;  %v1929_v4 = vpop.f32.mrb[62].mxu1 }
 0x232   :  { %v1721_v5 = vpack.c.bf16 %v1161_v1, %v1161_v1  ;;  %v1164_v6 = vadd.f32 %v1929_v4, %v2244_v9  ;;  %v1155_v7 = vpop.f32.mrb[63].mxu1 }
 0x233   :  { %v1719_v8 = vpack.c.bf16 %v1153_v3, %v1153_v3  ;;  %v1156_v10 = vadd.f32 %v2244_v9, %v1155_v7 }
 0x234   :  { %1486 = vst.msk [vmem:[%s2571_s5 + $0xf8] sm:$0xf] %vm1423_vm2, %v1721_v5  ;;  %v1722_v11 = vpack.c.bf16 %v1164_v6, %v1164_v6 }
 0x235   :  { %1484 = vst.msk [vmem:[%s2571_s5 + $0xf0] sm:$0xf] %vm1423_vm2, %v1719_v8  ;;  %v1720_v12 = vpack.c.bf16 %v1156_v10, %v1156_v10 }
 0x236   :  { %1487 = vst.msk [vmem:[%s2571_s5 + $0xfc] sm:$0xf] %vm1423_vm2, %v1722_v11 }
 0x237   :  { %1485 = vst.msk [vmem:[%s2571_s5 + $0xf4] sm:$0xf] %vm1423_vm2, %v1720_v12 }

</bundles_post_ra>
